<compile_context>
chip_gen: v5e
topology: v5e:2x2
jax: 0.10.0
libtpu: 0.0.40
codegen_flags: <defaults>
</compile_context>

<pallas_src>
import functools

import numpy as np
import jax
import jax.numpy as jnp
from jax.experimental import pallas as pl
from jax.experimental.pallas import tpu as pltpu


def _round_up(a, b):
    return (a + b - 1) // b * b


# ----------------------------------------------------------------------------
# Pallas kernels
# ----------------------------------------------------------------------------
def _mm_bias_relu_kernel(x_ref, w_ref, b_ref, o_ref, *, apply_relu):
    """One M-tile of o = relu(x @ w + b).  bf16 MXU, f32 accumulate/epilogue."""
    acc = jnp.dot(x_ref[...], w_ref[...], preferred_element_type=jnp.float32)
    acc = acc + b_ref[...]                      # (1, Np) broadcast over rows
    if apply_relu:
        acc = jnp.maximum(acc, 0.0)
    o_ref[...] = acc.astype(o_ref.dtype)


def pallas_matmul_bias(x, w, b, *, apply_relu=True, out_dtype=jnp.bfloat16, block_m=256):
    """x: (M, K) bf16, w: (K, Np) bf16 with Np % 128 == 0, b: (1, Np) f32 -> (M, Np).

    Tiled over M ("parallel" => both TensorCores on v7x, pipelined prefetch on all chips).
    """
    M, K = x.shape
    Kw, Np = w.shape
    assert K == Kw and Np % 128 == 0

    bm = min(block_m, _round_up(max(M, 8), 8))
    Mp = _round_up(M, bm)
    if Mp != M:
        x = jnp.pad(x, ((0, Mp - M), (0, 0)))   # zero rows; sliced off below

    out = pl.pallas_call(
        functools.partial(_mm_bias_relu_kernel, apply_relu=apply_relu),
        out_shape=jax.ShapeDtypeStruct((Mp, Np), out_dtype),
        grid=(Mp // bm,),
        in_specs=[
            pl.BlockSpec((bm, K), lambda i: (i, 0)),
            pl.BlockSpec((K, Np), lambda i: (0, 0)),
            pl.BlockSpec((1, Np), lambda i: (0, 0)),
        ],
        out_specs=pl.BlockSpec((bm, Np), lambda i: (i, 0)),
        compiler_params=pltpu.CompilerParams(
            dimension_semantics=("parallel",),
            vmem_limit_bytes=32 * 1024 * 1024,
        ),
    )(x, w, b)
    return out[:M] if Mp != M else out


def _fused_fc_kernel(x_ref, w1_ref, b1_ref, w2_ref, b2_ref, o_ref):
    """o = relu(relu(x @ w1 + b1) @ w2 + b2); intermediate stays in registers/VMEM."""
    h = jnp.dot(x_ref[...], w1_ref[...], preferred_element_type=jnp.float32)
    h = jnp.maximum(h + b1_ref[...], 0.0)
    y = jnp.dot(h.astype(w2_ref.dtype), w2_ref[...], preferred_element_type=jnp.float32)
    y = jnp.maximum(y + b2_ref[...], 0.0)
    o_ref[...] = y


def pallas_fused_fc(x, w1, b1, w2, b2):
    """x: (M, K1) bf16, w1: (K1, N1) bf16, w2: (N1, N2) bf16, biases (1, N) f32."""
    M, K1 = x.shape
    N1 = w1.shape[1]
    N2 = w2.shape[1]
    return pl.pallas_call(
        _fused_fc_kernel,
        out_shape=jax.ShapeDtypeStruct((M, N2), jnp.float32),
        grid=(1,),
        in_specs=[
            pl.BlockSpec((M, K1), lambda i: (0, 0)),
            pl.BlockSpec((K1, N1), lambda i: (0, 0)),
            pl.BlockSpec((1, N1), lambda i: (0, 0)),
            pl.BlockSpec((N1, N2), lambda i: (0, 0)),
            pl.BlockSpec((1, N2), lambda i: (0, 0)),
        ],
        out_specs=pl.BlockSpec((M, N2), lambda i: (0, 0)),
        compiler_params=pltpu.CompilerParams(vmem_limit_bytes=32 * 1024 * 1024),
    )(x, w1, b1, w2, b2)


def _max_reduce_kernel(w_ref, o_ref, *, num_windows):
    """Elementwise max over the leading window axis (MaxPool2d reduction)."""
    acc = w_ref[0]
    for k in range(1, num_windows):
        acc = jnp.maximum(acc, w_ref[k])
    o_ref[...] = acc


def pallas_max_windows(windows):
    """windows: (KK, R, 128) -> (R, 128).  Lane-dense (last dim = 128) full-lane stores."""
    KK, R, L = windows.shape
    return pl.pallas_call(
        functools.partial(_max_reduce_kernel, num_windows=KK),
        out_shape=jax.ShapeDtypeStruct((R, L), windows.dtype),
        grid=(1,),
        in_specs=[pl.BlockSpec((KK, R, L), lambda i: (0, 0, 0))],
        out_specs=pl.BlockSpec((R, L), lambda i: (0, 0)),
        compiler_params=pltpu.CompilerParams(vmem_limit_bytes=32 * 1024 * 1024),
    )(windows)


# ----------------------------------------------------------------------------
# Layer wrappers (JAX glue: padding / im2col / reshapes; compute in Pallas)
# ----------------------------------------------------------------------------
def conv2d_bias_relu(x, wp, bp, *, cout, kh, kw, stride, padding):
    """x: (N,H,W,Cin) NHWC bf16; wp: (Kp, Np) prepared bf16 weight (K and Cout padded);
    bp: (1, Np) f32 prepared bias."""
    N, H, W, Cin = x.shape
    Kp = wp.shape[0]
    xp = jnp.pad(x, ((0, 0), (padding, padding), (padding, padding), (0, 0)))
    Ho = (H + 2 * padding - kh) // stride + 1
    Wo = (W + 2 * padding - kw) // stride + 1
    cols = []
    for dh in range(kh):
        for dw in range(kw):
            cols.append(xp[:, dh:dh + stride * (Ho - 1) + 1:stride,
                              dw:dw + stride * (Wo - 1) + 1:stride, :])
    # TODO(synk): stride-1 conv tap loop could be folded into the kernel as a grid
    # reduction to avoid this HBM im2col duplication; kept in XLA (tiny at these shapes).
    patches = jnp.stack(cols, axis=3).reshape(N * Ho * Wo, kh * kw * Cin)
    K = kh * kw * Cin
    if Kp != K:
        patches = jnp.pad(patches, ((0, 0), (0, Kp - K)))
    y = pallas_matmul_bias(patches.astype(jnp.bfloat16), wp, bp,
                           apply_relu=True, out_dtype=jnp.bfloat16)
    return y[:, :cout].reshape(N, Ho, Wo, cout)


def maxpool_3x3_s2(x):
    """MaxPool2d(kernel_size=3, stride=2, padding=0, floor mode). x: (N,H,W,C)."""
    N, H, W, C = x.shape
    k, s = 3, 2
    Ho = (H - k) // s + 1
    Wo = (W - k) // s + 1
    wins = []
    for dh in range(k):
        for dw in range(k):
            wins.append(x[:, dh:dh + s * (Ho - 1) + 1:s,
                             dw:dw + s * (Wo - 1) + 1:s, :])
    flat = N * Ho * Wo * C
    P = _round_up(flat, 8 * 128)                # lane/sublane aligned
    w = jnp.stack(wins, axis=0).reshape(k * k, flat)
    if P != flat:
        w = jnp.pad(w, ((0, 0), (0, P - flat)))
    w = w.reshape(k * k, P // 128, 128)
    y = pallas_max_windows(w)
    return y.reshape(-1)[:flat].reshape(N, Ho, Wo, C)


def adaptive_avg_pool(x, out_h, out_w):
    """AdaptiveAvgPool2d((out_h,out_w)), PyTorch window semantics, in plain jnp. x: (N,H,W,C)."""
    N, H, W, C = x.shape
    A = np.zeros((out_h * out_w, H * W), dtype=np.float32)
    for oi in range(out_h):
        hs, he = (oi * H) // out_h, -((-(oi + 1) * H) // out_h)
        for oj in range(out_w):
            ws, we = (oj * W) // out_w, -((-(oj + 1) * W) // out_w)
            cnt = float((he - hs) * (we - ws))
            for ii in range(hs, he):
                for jj in range(ws, we):
                    A[oi * out_w + oj, ii * W + jj] = 1.0 / cnt
    y = jnp.einsum('ps,nsc->npc', jnp.asarray(A),
                   x.reshape(N, H * W, C).astype(jnp.float32))
    return y.reshape(N, out_h, out_w, C)


# ----------------------------------------------------------------------------
# Full forward pass (cfg holds static Python ints; bound via functools.partial)
# ----------------------------------------------------------------------------
def palexnet_encoder_forward(cfg, params, x_nchw):
    x = jnp.transpose(x_nchw, (0, 2, 3, 1)).astype(jnp.bfloat16)   # NCHW -> NHWC, bf16
    x = conv2d_bias_relu(x, params["conv1_w"], params["conv1_b"],
                         cout=cfg["c1"], kh=11, kw=11, stride=4, padding=2)
    x = maxpool_3x3_s2(x)
    x = conv2d_bias_relu(x, params["conv2_w"], params["conv2_b"],
                         cout=cfg["c2"], kh=5, kw=5, stride=1, padding=2)
    x = maxpool_3x3_s2(x)
    x = conv2d_bias_relu(x, params["conv3_w"], params["conv3_b"],
                         cout=cfg["c3"], kh=3, kw=3, stride=1, padding=1)
    x = conv2d_bias_relu(x, params["conv4_w"], params["conv4_b"],
                         cout=cfg["c4"], kh=3, kw=3, stride=1, padding=1)
    x = conv2d_bias_relu(x, params["conv5_w"], params["conv5_b"],
                         cout=cfg["c5"], kh=3, kw=3, stride=1, padding=1)
    x = maxpool_3x3_s2(x)
    x = adaptive_avg_pool(x, 6, 6)
    # torch.flatten(x, 1) on an NCHW tensor -> (N, C*6*6) in (c, h, w) order
    N = x.shape[0]
    x = jnp.transpose(x, (0, 3, 1, 2)).reshape(N, -1)
    x = pallas_fused_fc(x.astype(jnp.bfloat16),
                        params["fc1_w"], params["fc1_b"],
                        params["fc2_w"], params["fc2_b"])
    return x


# ----------------------------------------------------------------------------
# Parameter init (PyTorch default U(-1/sqrt(fan_in), 1/sqrt(fan_in))) + one-time prep
# ----------------------------------------------------------------------------
def _init_conv(key, cout, cin, kh, kw):
    kw_, kb_ = jax.random.split(key)
    bound = 1.0 / np.sqrt(cin * kh * kw)
    w = jax.random.uniform(kw_, (cout, cin, kh, kw), jnp.float32, -bound, bound)
    b = jax.random.uniform(kb_, (cout,), jnp.float32, -bound, bound)
    return w, b


def _init_linear(key, out_f, in_f):
    kw_, kb_ = jax.random.split(key)
    bound = 1.0 / np.sqrt(in_f)
    w = jax.random.uniform(kw_, (out_f, in_f), jnp.float32, -bound, bound)
    b = jax.random.uniform(kb_, (out_f,), jnp.float32, -bound, bound)
    return w, b


def prepare_conv_params(w, b):
    """torch (Cout,Cin,KH,KW) -> im2col weight (Kp, Np) bf16 (K, Cout zero-padded to x128)."""
    cout, cin, kh, kw = w.shape
    K = kh * kw * cin
    Kp = _round_up(K, 128)
    Np = _round_up(cout, 128)
    w2 = jnp.transpose(w, (2, 3, 1, 0)).reshape(K, cout)
    w2 = jnp.pad(w2, ((0, Kp - K), (0, Np - cout))).astype(jnp.bfloat16)
    b2 = jnp.pad(b, (0, Np - cout)).astype(jnp.float32).reshape(1, Np)
    return w2, b2


def prepare_fc_params(w, b):
    """torch Linear weight (out, in) -> matmul-ready (in, out) bf16; bias (1, out) f32."""
    return jnp.transpose(w, (1, 0)).astype(jnp.bfloat16), b.astype(jnp.float32).reshape(1, -1)


if __name__ == "__main__":
    p = 0.25  # PAlexNetEncoder width factor (keeps shapes small)
    c1o = int(64 * p)
    c2o = int(192 * p)
    c3o = int(384 * p)
    c4o = int(256 * p)
    c5o = int(256 * p)
    f1i = int(256 * 6 * 6 * p)
    f1o = int(1024 * p)
    f2i = int(1024 * p)
    f2o = int(1024 * p)
    assert c5o * 6 * 6 == f1i and f1o == f2i
    assert f1i % 128 == 0 and f1o % 128 == 0 and f2o % 128 == 0  # lane-dense FC dims at p=0.25

    key = jax.random.PRNGKey(0)
    keys = jax.random.split(key, 8)

    raw_conv = {
        "conv1": _init_conv(keys[0], c1o, 3, 11, 11),    # keep_dim_in
        "conv2": _init_conv(keys[1], c2o, c1o, 5, 5),
        "conv3": _init_conv(keys[2], c3o, c2o, 3, 3),
        "conv4": _init_conv(keys[3], c4o, c3o, 3, 3),
        "conv5": _init_conv(keys[4], c5o, c4o, 3, 3),
    }
    raw_fc1 = _init_linear(keys[5], f1o, f1i)
    raw_fc2 = _init_linear(keys[6], f2o, f2i)

    params = {}
    for name, (w, b) in raw_conv.items():
        params[name + "_w"], params[name + "_b"] = prepare_conv_params(w, b)
    params["fc1_w"], params["fc1_b"] = prepare_fc_params(*raw_fc1)
    params["fc2_w"], params["fc2_b"] = prepare_fc_params(*raw_fc2)

    cfg = {"c1": c1o, "c2": c2o, "c3": c3o, "c4": c4o, "c5": c5o}

    # --- quick numerical self-check of the tiled matmul kernel (exercises M padding/grid) ---
    xt = jax.random.normal(keys[0], (300, 384), jnp.float32).astype(jnp.bfloat16)
    wt = jax.random.normal(keys[1], (384, 128), jnp.float32).astype(jnp.bfloat16)
    bt = jax.random.normal(keys[2], (128,), jnp.float32)
    got = pallas_matmul_bias(xt, wt, bt.reshape(1, -1), apply_relu=True, out_dtype=jnp.float32)
    want = jnp.maximum(xt.astype(jnp.float32) @ wt.astype(jnp.float32) + bt, 0.0)
    assert got.shape == want.shape
    assert bool(jnp.allclose(got, want, atol=1e-1, rtol=5e-2)), \
        float(jnp.max(jnp.abs(got - want)))

    # PyTorch-style NCHW input
    x = jax.random.normal(keys[7], (2, 3, 128, 128), jnp.float32)

    fwd = jax.jit(functools.partial(palexnet_encoder_forward, cfg))
    out = fwd(params, x)
    out = jax.block_until_ready(out)
    assert out.shape == (2, f2o), out.shape
    assert bool(jnp.all(out >= 0.0))  # final ReLU
    print("KERNEL_OK")
</pallas_src>

<mosaic_0001>
module attributes {stable_mosaic.version = 11 : i64} {
  func.func @_mm_bias_relu_kernel(%arg0: i32, %arg1: memref<256x384xbf16, #tpu.memory_space<vmem>>, %arg2: memref<384x128xbf16, #tpu.memory_space<vmem>>, %arg3: memref<1x128xf32, #tpu.memory_space<vmem>>, %arg4: memref<256x128xf32, #tpu.memory_space<vmem>>) attributes {dimension_semantics = [#tpu.dimension_semantics<parallel>], iteration_bounds = array<i64: 2>, scalar_prefetch = 0 : i64, scratch_operands = 0 : i64, tpu.core_type = #tpu.core_type<tc>, window_params = [{transform_indices = @transform_0, window_bounds = array<i64: 256, 384>}, {pipeline_mode = #tpu.pipeline_mode<synchronous>, transform_indices = @transform_1, window_bounds = array<i64: 384, 128>}, {pipeline_mode = #tpu.pipeline_mode<synchronous>, transform_indices = @transform_2, window_bounds = array<i64: 1, 128>}, {transform_indices = @transform_3, window_bounds = array<i64: 256, 128>}]} {
    %c0 = arith.constant 0 : index
    %c0_0 = arith.constant 0 : index
    %0 = vector.load %arg1[%c0, %c0_0] : memref<256x384xbf16, #tpu.memory_space<vmem>>, vector<256x384xbf16>
    %c0_1 = arith.constant 0 : index
    %c0_2 = arith.constant 0 : index
    %1 = vector.load %arg2[%c0_1, %c0_2] : memref<384x128xbf16, #tpu.memory_space<vmem>>, vector<384x128xbf16>
    %cst = arith.constant dense<0.000000e+00> : vector<256x128xf32>
    %2 = tpu.matmul %0, %1, %cst {dimension_numbers = #tpu.dot_dimension_numbers<[1], [0], [0], [1], [0, 0, 1, 1], [], []>} : vector<256x384xbf16>, vector<384x128xbf16>, vector<256x128xf32> -> vector<256x128xf32>
    %c0_3 = arith.constant 0 : index
    %c0_4 = arith.constant 0 : index
    %3 = vector.load %arg3[%c0_3, %c0_4] : memref<1x128xf32, #tpu.memory_space<vmem>>, vector<1x128xf32>
    %4 = vector.broadcast %3 : vector<1x128xf32> to vector<256x128xf32>
    %5 = arith.addf %2, %4 : vector<256x128xf32>
    %cst_5 = arith.constant 0.000000e+00 : f32
    %6 = vector.broadcast %cst_5 : f32 to vector<256x128xf32>
    %7 = arith.maximumf %5, %6 : vector<256x128xf32>
    %c0_6 = arith.constant 0 : index
    %c0_7 = arith.constant 0 : index
    %8 = vector.load %arg4[%c0_6, %c0_7] : memref<256x128xf32, #tpu.memory_space<vmem>>, vector<256x128xf32>
    tpu.vector_store %arg4[%c0_6, %c0_7], %7 {strides = array<i32>} : memref<256x128xf32, #tpu.memory_space<vmem>>, vector<256x128xf32>,
    return
  }
  func.func @transform_0(%arg0: i32) -> (i32, i32) {
    %c0_i32 = arith.constant 0 : i32
    %c0_i32_0 = arith.constant 0 : i32
    return %arg0, %c0_i32 : i32, i32
  }
  func.func @transform_1(%arg0: i32) -> (i32, i32) {
    %c0_i32 = arith.constant 0 : i32
    %c0_i32_0 = arith.constant 0 : i32
    %c0_i32_1 = arith.constant 0 : i32
    return %c0_i32, %c0_i32_0 : i32, i32
  }
  func.func @transform_2(%arg0: i32) -> (i32, i32) {
    %c0_i32 = arith.constant 0 : i32
    %c0_i32_0 = arith.constant 0 : i32
    %c0_i32_1 = arith.constant 0 : i32
    return %c0_i32, %c0_i32_0 : i32, i32
  }
  func.func @transform_3(%arg0: i32) -> (i32, i32) {
    %c0_i32 = arith.constant 0 : i32
    %c0_i32_0 = arith.constant 0 : i32
    return %arg0, %c0_i32 : i32, i32
  }
}

</mosaic_0001>

<bundles_post_ra>
// kernel: tpu_custom_call.1
= control target key start
LH: loop header
LB: loop body
LE: loop exit
PB: predicated region body
PF: predicated region fallthrough
CT: control target
= control target key end

     0   :  { %8 = vsyncpa [#allocation3], 0  ;;  %s2180_s0 = inlined_call_operand.hbm [shape: bf16[512,384], index: 0, kind: input, shape index: {}]   ;;  %s2181_s1 = inlined_call_operand.hbm [shape: bf16[384,128], index: 1, kind: input, shape index: {}]   ;;  %s2182_s2 = inlined_call_operand.vmem [shape: f32[1,128], index: 2, kind: input, shape index: {}]   ;;  %s2183_s3 = inlined_call_operand.hbm [shape: f32[512,128], index: 3, kind: output, shape index: {}]  }
   0x1   :  { %10 = vsyncpa [#allocation3 + $0x1], 0 }
   0x2   :  { %11 = vsyncpa [#allocation6], 0 }
   0x3   :  { %12 = vsyncpa [#allocation4], 0 }
   0x4   :  { %14 = vsyncpa [#allocation4 + $0x1], 0  ;;  %s1783_s12 = smov 0   ;;  %s1785_s13 = smov 0  }
   0x5   :  { %s1787_s14 = smov 0   ;;  %s1789_s15 = smov 0  }
   0x6 LB: > { %s1804_s16 = sadd.s32 4294967295, %s1754_s15   ;;  %s1157_s17 = sadd.s32 4294967294, %s1754_s15   ;;  %s1754_s15 = sphi %s1789_s15, %s2193_s15   ;;  %s1750_s14 = sphi %s1787_s14, %s2192_s14   ;;  %s1746_s13 = sphi %s1785_s13, %s2191_s13   ;;  %s1742_s12 = sphi %s1783_s12, %s2190_s12  }
   0x7   : > { %p40_p0 = scmp.ne.s32.totalorder %s1746_s13, %s1742_s12  ;;  %p41_p1 = scmp.eq.s32.totalorder %s1804_s16, 0 }
   0x8   : > { %p106_p2 = scmp.eq.s32.totalorder %s1804_s16, 1  ;;  %p112_p3 = scmp.eq.s32.totalorder %s1157_s17, 1 }
   0x9   : > { %p1813_p4 = por %p41_p1, %p40_p0  ;;  %p1158_p5 = scmp.ge.s32.totalorder %s1754_s15, 1 }
   0xa   : > { %p1818_p6 = por %p112_p3, %p40_p0  ;;  %p119_p7 = scmp.lt.s32.totalorder %s1754_s15, 3 }
   0xb   : > { %s130_s22 = sshll.u32 %s2181_s1, 4  ;;  %s1756_s24 = smov [#allocation5]   ;;  %s131_s22 = int_to_ptr.hbm [resolvable:$true] %s130_s22 }
   0xc   : > { %p1826_p8 = pnand %p1158_p5, %p119_p7  ;;  %s132_s25 = sshll.u32 %s1756_s24, 4  ;;  %s133_s25 = int_to_ptr.vmem [resolvable:$true] %s132_s25 }
   0xd   : > { %s1836_s26 = sadd.s32 1, %s1754_s15   ;;  %s1757_s27 = smov 64  }
   0xe   : > { %p1568_p9 = pneg %p1826_p8  ;;  %s1758_s28 = smov 4  }
   0xf   : > { %s24_s29 = ssub.s32 %s1754_s15, %s1836_s26  ;;  %s27_s30 = sadd.s32 1, %s1750_s14 }
  0x10   : > { %p1569_p10 = pnand %p1568_p9, %p41_p1  ;;  %p25_p12 = scmp.eq.s32.totalorder %s24_s29, 0 }
  0x11   : > { %p34_p13 = scmp.ne.s32.totalorder %s1750_s14, %s1746_s13  ;;  %p35_p0 = scmp.eq.s32.totalorder %s1754_s15, 0 }
  0x12   : > { %1571 = dma.hbm_to_vmem [thread:$0]  (!%p1569_p10), %s131_s22, 3072, %s133_s25, [#allocation6], %s1757_s27, %s1757_s27, %s1758_s28  }
  0x13   : > { %p1581_p3 = scmp.lt.s32.totalorder %s1754_s15, 2  ;;  %p36_p5 = por %p35_p0, %p34_p13 }
  0x14   : > { %s1846_s4 = scalar_select %p25_p12, %s1750_s14, %s27_s30  }
  0x15   : > { %p1850_p7 = por %p106_p2, %p34_p13  ;;  %s149_s6 = sand.u32 1, %s1750_s14  }
  0x16   : > { %s1558_s7 = smul.u32 384, %s1754_s15  ;;  %p1859_p9 = pnand %p1581_p3, %p36_p5 }
  0x17   : > { %s1557_s8 = smul.u32 384, %s149_s6  ;;  %s150_s24 = scalar_lea.sflag [#allocation3], %s149_s6 }
  0x18   : > { %s159_s11 = scalar_lea.hbm %s2180_s0, %s1558_s7  ;;  %p1658_p10 = pneg %p1859_p9 }
  0x19   : > { %s160_s20 = sshll.u32 %s159_s11, 4  ;;  %s153_s21 = scalar_lea.vmem [#allocation2], %s1557_s8  ;;  %s161_s20 = int_to_ptr.hbm [resolvable:$true] %s160_s20 }
  0x1a   : > { %s162_s22 = sshll.u32 %s153_s21, 4  ;;  %s1654_s25 = sshra.s32 %s161_s20, 4  ;;  %s163_s22 = int_to_ptr.vmem [resolvable:$true] %s162_s22  ;;  %s1655_s25 = int_to_ptr.hbm [resolvable:$true] %s1654_s25 }
  0x1b   : > { %s1656_s27 = scalar_lea.hbm %s1655_s25, 384  ;;  %s1661_s30 = scalar_lea.hbm %s2180_s0, 768 }
  0x1c   : > { %p1657_p2 = scmp.ne.s32.totalorder %s1655_s25, %s1656_s27  ;;  %p1662_p0 = scmp.lt.s32.totalorder %s1655_s25, %s2180_s0 }
  0x1d   : > { %p1663_p3 = scmp.lt.s32.totalorder %s1661_s30, %s1656_s27 }
  0x1e   : > { %p1659_p12 = pnand %p1658_p10, %p1657_p2 }
  0x1f   : > { %p1664_p5 = por %p1663_p3, %p1662_p0 }
  0x20   : > { %p1660_p13 = pneg %p1659_p12 }
  0x22   : > { %p1665_p11 = pnand %p1664_p5, %p1660_p13 }
  0x24   : > { %1668 = shalt.err (!%p1665_p11)
}
  0x25   : > { %s1759_s6 = smov 192   ;;  %s1760_s8 = smov 12  }
  0x26   : > { %1575 = dma.hbm_to_vmem [thread:$0]  (!%p1859_p9), %s161_s20, 6144, %s163_s22, %s150_s24, %s1759_s6, %s1759_s6, %s1760_s8  }
  0x27   : > { %174 = sbr.rel (%p1826_p8) target bundleno = 405 (0x195), region = 32  ;;  %s1876_s10 = sand.u32 (!%p1826_p8), 1, %s1746_s13  }
  0x28   : > { %s1559_s11 = smul.u32 (!%p1826_p8), 384, %s1876_s10  ;;  %s177_s21 = scalar_lea.sflag (!%p1826_p8), [#allocation3], %s1876_s10 }
  0x2a   : > { %s1880_s25 = scalar_lea.vmem (!%p1826_p8), [#allocation2], %s1559_s11 }
  0x2c   : > { %1729 = dma.done.wait (%p1813_p4), %s177_s21, 6144  }
  0x2d   : > { %1731 = vsyncadd (%p1813_p4), %s177_s21, 4294961152 }
  0x2e   : > { %1733 = dma.done.wait (%p41_p1), [#allocation6], 3072  }
  0x2f   : > { %1735 = vsyncadd (%p41_p1), [#allocation6], 4294964224  ;;  %v1515_v0 = vld [vmem:[#allocation5 + $0x38] sm:$0xff]  ;;  %v1514_v3 = vld [vmem:[#allocation5 + $0x30] sm:$0xff]  ;;  %s1166_s17 = sshll.u32 %s1876_s10, 8  ;;  %s1532_s22 = sshll.u32 %s1804_s16, 8 }
  0x30   : > { %v1890_v1 = vld [vmem:[#allocation5 + $0x78] sm:$0xff]  ;;  %727 = vmatpush.bf16.msra.mxu0 %v1515_v0  ;;  %1533 = vmatpush.bf16.msra.mxu3 %v1515_v0  ;;  %v1896_v4 = vld [vmem:[#allocation5 + $0x70] sm:$0xff]  ;;  %v1513_v6 = vld [vmem:[#allocation5 + $0x28] sm:$0xff]  ;;  %s2014_s20 = scalar_lea.vmem [#allocation7], %s1166_s17  ;;  %s1070_s28 = scalar_lea.hbm %s2183_s3, %s1532_s22 }
  0x31   : > { %v1892_v2 = vld [vmem:[#allocation5 + $0xb8] sm:$0xff]  ;;  %816 = vmatpush.bf16.msra.mxu1 %v1890_v1  ;;  %v1898_v5 = vld [vmem:[#allocation5 + $0xb0] sm:$0xff]  ;;  %v1521_v7 = vld [vmem:[#allocation5 + $0x68] sm:$0xff]  ;;  %s1071_s16 = sshll.u32 %s2014_s20, 4  ;;  %s1073_s29 = sshll.u32 %s1070_s28, 4  ;;  %s1072_s16 = int_to_ptr.vmem [resolvable:$true] %s1071_s16  ;;  %s1074_s29 = int_to_ptr.hbm [resolvable:$true] %s1073_s29 }
  0x32   : > { %905 = vmatpush.bf16.msra.mxu2 %v1892_v2  ;;  %v1902_v8 = vld [vmem:[#allocation5 + $0xa8] sm:$0xff]  ;;  %v1512_v9 = vld [vmem:[#allocation5 + $0x20] sm:$0xff]  ;;  %v1511_v12 = vld [vmem:[#allocation5 + $0x18] sm:$0xff]  ;;  %s1059_s30 = scalar_lea.sflag [#allocation4], %s1876_s10  ;;  %s1698_s7 = sshra.s32 %s1074_s29, 4  ;;  %s1699_s7 = int_to_ptr.hbm [resolvable:$true] %s1698_s7 }
  0x33   : > { %v1520_v10 = vld [vmem:[#allocation5 + $0x60] sm:$0xff]  ;;  %v1519_v13 = vld [vmem:[#allocation5 + $0x58] sm:$0xff]  ;;  %v1510_v15 = vld [vmem:[#allocation5 + $0x10] sm:$0xff]  ;;  %s1700_s9 = scalar_lea.hbm %s1699_s7, 256  ;;  %s1704_s11 = scalar_lea.hbm %s2183_s3, 512 }
  0x34   : > { %728 = vmatpush.bf16.msra.mxu0 %v1514_v3  ;;  %1534 = vmatpush.bf16.msra.mxu3 %v1514_v3  ;;  %v1905_v11 = vld [vmem:[#allocation5 + $0xa0] sm:$0xff]  ;;  %v1908_v14 = vld [vmem:[#allocation5 + $0x98] sm:$0xff]  ;;  %v1518_v16 = vld [vmem:[#allocation5 + $0x50] sm:$0xff]  ;;  %p1701_p1 = scmp.ne.s32.totalorder %s1699_s7, %s1700_s9  ;;  %p1705_p11 = scmp.lt.s32.totalorder %s1699_s7, %s2183_s3 }
  0x35   : > { %817 = vmatpush.bf16.msra.mxu1 %v1896_v4  ;;  %v1911_v17 = vld [vmem:[#allocation5 + $0x90] sm:$0xff]  ;;  %v1509_v18 = vld [vmem:[#allocation5 + $0x8] sm:$0xff]  ;;  %v1508_v21 = vld [vmem:[#allocation5] sm:$0xff]  ;;  %p1706_p9 = scmp.lt.s32.totalorder %s1704_s11, %s1700_s9 }
  0x36   : > { %906 = vmatpush.bf16.msra.mxu2 %v1898_v5  ;;  %v1517_v19 = vld [vmem:[#allocation5 + $0x48] sm:$0xff]  ;;  %v1516_v22 = vld [vmem:[#allocation5 + $0x40] sm:$0xff]  ;;  %v1171_v29 = vld [vmem:[%s1880_s25 + $0xc] sm:$0xf0]  ;;  %p1702_p4 = pnand %p1701_p1, %p1850_p7 }
  0x37   : > { %v1914_v20 = vld [vmem:[#allocation5 + $0x88] sm:$0xff]  ;;  %v1916_v23 = vld [vmem:[#allocation5 + $0x80] sm:$0xff]  ;;  %v1462_v31 = vld [vmem:[%s1880_s25 + $0x10] sm:$0xf0]  ;;  %p1707_p2 = por %p1706_p9, %p1705_p11 }
  0x38   : > { %729 = vmatpush.bf16.msra.mxu0 %v1513_v6  ;;  %1535 = vmatpush.bf16.msra.mxu3 %v1513_v6  ;;  %v1169_v24 = vld [vmem:[%s1880_s25] sm:$0xf]  ;;  %v1461_v25 = vld [vmem:[%s1880_s25 + $0x8] sm:$0xf0]  ;;  %v1460_v28 = vld [vmem:[%s1880_s25 + $0x4] sm:$0xf]  ;;  %p1703_p8 = pneg %p1702_p4 }
  0x39   : > { %818 = vmatpush.bf16.msra.mxu1 %v1521_v7  ;;  %v1313_v26 = vld [vmem:[%s1880_s25 + $0x120] sm:$0xf]  ;;  %v1497_v27 = vld [vmem:[%s1880_s25 + $0x128] sm:$0xf0]  ;;  %v1177_v30 = vld [vmem:[%s1880_s25 + $0x8] sm:$0xf]  ;;  %v1170_v32 = vor.u32 %v1461_v25, %v1169_v24  ;;  %v1174_v34 = vor.u32 %v1460_v28, %v1171_v29 }
  0x3a   : > { %907 = vmatpush.bf16.msra.mxu2 %v1902_v8  ;;  %v1314_v33 = vor.u32 %v1497_v27, %v1313_v26  ;;  %v1178_v35 = vor.u32 %v1462_v31, %v1177_v30  ;;  %v1181_v36 = vld [vmem:[%s1880_s25 + $0x18] sm:$0xf]  ;;  %v1464_v37 = vld [vmem:[%s1880_s25 + $0x20] sm:$0xf0]  ;;  %v1463_v40 = vld [vmem:[%s1880_s25 + $0x1c] sm:$0xf]  ;;  %p1708_p10 = pnand %p1707_p2, %p1703_p8 }
  0x3b   : > { %v1325_v38 = vld [vmem:[%s1880_s25 + $0x138] sm:$0xf]  ;;  %v1500_v39 = vld [vmem:[%s1880_s25 + $0x140] sm:$0xf0]  ;;  %v1183_v41 = vld [vmem:[%s1880_s25 + $0x24] sm:$0xf0]  ;;  %v1182_v44 = vor.u32 %v1464_v37, %v1181_v36 }
  0x3c   : > { %730 = vmatpush.bf16.msra.mxu0 %v1512_v9  ;;  %1536 = vmatpush.bf16.msra.mxu3 %v1512_v9  ;;  %v1189_v42 = vld [vmem:[%s1880_s25 + $0x20] sm:$0xf]  ;;  %v1465_v43 = vld [vmem:[%s1880_s25 + $0x28] sm:$0xf0]  ;;  %v1326_v45 = vor.u32 %v1500_v39, %v1325_v38  ;;  %v1186_v46 = vor.u32 %v1463_v40, %v1183_v41  ;;  %v1193_v48 = vld [vmem:[%s1880_s25 + $0x30] sm:$0xf] }
  0x3d   : > { %819 = vmatpush.bf16.msra.mxu1 %v1520_v10  ;;  %v1190_v47 = vor.u32 %v1465_v43, %v1189_v42  ;;  %v1467_v49 = vld [vmem:[%s1880_s25 + $0x38] sm:$0xf0]  ;;  %v1337_v50 = vld [vmem:[%s1880_s25 + $0x150] sm:$0xf]  ;;  %v1466_v52 = vld [vmem:[%s1880_s25 + $0x34] sm:$0xf] }
  0x3e   : > { %908 = vmatpush.bf16.msra.mxu2 %v1905_v11  ;;  %v1503_v51 = vld [vmem:[%s1880_s25 + $0x158] sm:$0xf0]  ;;  %v1195_v53 = vld [vmem:[%s1880_s25 + $0x3c] sm:$0xf0]  ;;  %v1201_v54 = vld [vmem:[%s1880_s25 + $0x38] sm:$0xf]  ;;  %v1194_v56 = vor.u32 %v1467_v49, %v1193_v48 }
  0x3f   : > { %v1468_v55 = vld [vmem:[%s1880_s25 + $0x40] sm:$0xf0]  ;;  %v1338_v57 = vor.u32 %v1503_v51, %v1337_v50  ;;  %v1198_v58 = vor.u32 %v1466_v52, %v1195_v53  ;;  %v1205_v60 = vld [vmem:[%s1880_s25 + $0x48] sm:$0xf]  ;;  %v1470_v61 = vld [vmem:[%s1880_s25 + $0x50] sm:$0xf0] }
  0x40   : > { %731 = vmatpush.bf16.msra.mxu0 %v1511_v12  ;;  %1537 = vmatpush.bf16.msra.mxu3 %v1511_v12  ;;  %v1202_v59 = vor.u32 %v1468_v55, %v1201_v54  ;;  %v1349_v62 = vld [vmem:[%s1880_s25 + $0x168] sm:$0xf]  ;;  %v1506_v63 = vld [vmem:[%s1880_s25 + $0x170] sm:$0xf0]  ;;  %v1469_v0 = vld [vmem:[%s1880_s25 + $0x4c] sm:$0xf] }
  0x41   : > { %820 = vmatpush.bf16.msra.mxu1 %v1519_v13  ;;  %v1471_v3 = vld [vmem:[%s1880_s25 + $0x58] sm:$0xf0]  ;;  %v1473_v9 = vld [vmem:[%s1880_s25 + $0x68] sm:$0xf0]  ;;  %v1315_v12 = vld [vmem:[%s1880_s25 + $0x12c] sm:$0xf0] }
  0x42   : > { %909 = vmatpush.bf16.msra.mxu2 %v1908_v14  ;;  %v1499_v24 = vld [vmem:[%s1880_s25 + $0x13c] sm:$0xf]  ;;  %v1327_v25 = vld [vmem:[%s1880_s25 + $0x144] sm:$0xf0]  ;;  %v1237_v26 = vld [vmem:[%s1880_s25 + $0x80] sm:$0xf] }
  0x43   : > { %v1477_v27 = vld [vmem:[%s1880_s25 + $0x88] sm:$0xf0]  ;;  %v1330_v29 = vor.u32 %v1499_v24, %v1327_v25  ;;  %v1339_v36 = vld [vmem:[%s1880_s25 + $0x15c] sm:$0xf0]  ;;  %v1249_v38 = vld [vmem:[%s1880_s25 + $0x98] sm:$0xf] }
  0x44   : > { %732 = vmatpush.bf16.msra.mxu0 %v1510_v15  ;;  %1538 = vmatpush.bf16.msra.mxu3 %v1510_v15  ;;  %v1474_v15 = vld [vmem:[%s1880_s25 + $0x70] sm:$0xf0]  ;;  %v1238_v31 = vor.u32 %v1477_v27, %v1237_v26  ;;  %v1243_v37 = vld [vmem:[%s1880_s25 + $0x9c] sm:$0xf0]  ;;  %v1480_v39 = vld [vmem:[%s1880_s25 + $0xa0] sm:$0xf0] }
  0x45   : > { %821 = vmatpush.bf16.msra.mxu1 %v1518_v16  ;;  %v1250_v43 = vor.u32 %v1480_v39, %v1249_v38  ;;  %v1351_v48 = vld [vmem:[%s1880_s25 + $0x174] sm:$0xf0]  ;;  %v1261_v50 = vld [vmem:[%s1880_s25 + $0xb0] sm:$0xf]  ;;  %v1483_v51 = vld [vmem:[%s1880_s25 + $0xb8] sm:$0xf0] }
  0x46   : > { %910 = vmatpush.bf16.msra.mxu2 %v1911_v17  ;;  %v1255_v49 = vld [vmem:[%s1880_s25 + $0xb4] sm:$0xf0]  ;;  %v1262_v55 = vor.u32 %v1483_v51, %v1261_v50  ;;  %v1489_v24 = vld [vmem:[%s1880_s25 + $0xe8] sm:$0xf0]  ;;  %v1492_v51 = vld [vmem:[%s1880_s25 + $0x100] sm:$0xf0] }
  0x47   : > { %v1297_v50 = vld [vmem:[%s1880_s25 + $0xf8] sm:$0xf] }
  0x48   : > { %733 = vmatpush.bf16.msra.mxu0 %v1509_v18  ;;  %1539 = vmatpush.bf16.msra.mxu3 %v1509_v18 }
  0x49   : > { %822 = vmatpush.bf16.msra.mxu1 %v1517_v19 }
  0x4a   : > { %911 = vmatpush.bf16.msra.mxu2 %v1914_v20 }
  0x4c   : > { %734 = vmatpush.bf16.msra.mxu0 %v1508_v21  ;;  %1540 = vmatpush.bf16.msra.mxu3 %v1508_v21  ;;  %v1476_v21 = vld [vmem:[%s1880_s25 + $0x80] sm:$0xf0] }
  0x4d   : > { %823 = vmatpush.bf16.msra.mxu1 %v1516_v22 }
  0x4e   : > { %912 = vmatpush.bf16.msra.mxu2 %v1916_v23 }
  0x4f   : > { %735 = vmatmul.bf16.vlgmr.msra.gmra.mxu0 %v1170_v32  ;;  %795 = vmatmul.bf16.vlgmr.msra.gmra.mxu3 %v1314_v33  ;;  %v1241_v32 = vld [vmem:[%s1880_s25 + $0x90] sm:$0xf]  ;;  %v1479_v33 = vld [vmem:[%s1880_s25 + $0x98] sm:$0xf0] }
  0x50   : > { %1541 = vmatpush.bf16.msrb.mxu3 %v1890_v1  ;;  %824 = vmatmul.bf16.vlgmr.msra.gmra.mxu1 %v1174_v34  ;;  %v1207_v1 = vld [vmem:[%s1880_s25 + $0x54] sm:$0xf0]  ;;  %v1478_v34 = vld [vmem:[%s1880_s25 + $0x94] sm:$0xf]  ;;  %v1242_v40 = vor.u32 %v1479_v33, %v1241_v32 }
  0x51   : > { %913 = vmatmul.bf16.vlgmr.msra.gmra.mxu2 %v1178_v35  ;;  %v1210_v6 = vor.u32 %v1469_v0, %v1207_v1  ;;  %v1502_v35 = vld [vmem:[%s1880_s25 + $0x154] sm:$0xf]  ;;  %v1246_v42 = vor.u32 %v1478_v34, %v1243_v37 }
  0x52   : > { %v1342_v41 = vor.u32 %v1502_v35, %v1339_v36  ;;  %v1486_v0 = vld [vmem:[%s1880_s25 + $0xd0] sm:$0xf0] }
  0x54   : > { %1542 = vmatpush.bf16.msrb.mxu3 %v1896_v4  ;;  %v1206_v4 = vor.u32 %v1470_v61, %v1205_v60  ;;  %v1321_v60 = vld [vmem:[%s1880_s25 + $0x128] sm:$0xf]  ;;  %v1498_v61 = vld [vmem:[%s1880_s25 + $0x130] sm:$0xf0] }
  0x58   : > { %1543 = vmatpush.bf16.msrb.mxu3 %v1521_v7 }
  0x5c   : > { %1544 = vmatpush.bf16.msrb.mxu3 %v1520_v10  ;;  %v1472_v10 = vld [vmem:[%s1880_s25 + $0x64] sm:$0xf] }
  0x5f   : > { %740 = vmatmul.bf16.gmra.mxu0 %v1182_v44  ;;  %800 = vmatmul.bf16.gmra.mxu3 %v1326_v45  ;;  %v1253_v44 = vld [vmem:[%s1880_s25 + $0xa8] sm:$0xf]  ;;  %v1482_v45 = vld [vmem:[%s1880_s25 + $0xb0] sm:$0xf0] }
  0x60   : > { %1545 = vmatpush.bf16.msrb.mxu3 %v1519_v13  ;;  %829 = vmatmul.bf16.gmra.mxu1 %v1186_v46  ;;  %v1219_v13 = vld [vmem:[%s1880_s25 + $0x6c] sm:$0xf0]  ;;  %v1481_v46 = vld [vmem:[%s1880_s25 + $0xac] sm:$0xf]  ;;  %v1254_v52 = vor.u32 %v1482_v45, %v1253_v44  ;;  %v1491_v45 = vld [vmem:[%s1880_s25 + $0xf8] sm:$0xf0] }
  0x61   : > { %918 = vmatmul.bf16.gmra.mxu2 %v1190_v47  ;;  %v1222_v18 = vor.u32 %v1472_v10, %v1219_v13  ;;  %v1505_v47 = vld [vmem:[%s1880_s25 + $0x16c] sm:$0xf]  ;;  %v1258_v54 = vor.u32 %v1481_v46, %v1255_v49  ;;  %v1289_v44 = vld [vmem:[%s1880_s25 + $0xf0] sm:$0xf]  ;;  %v1490_v46 = vld [vmem:[%s1880_s25 + $0xf4] sm:$0xf] }
  0x62   : > { %v1354_v53 = vor.u32 %v1505_v47, %v1351_v48  ;;  %v1345_v47 = vld [vmem:[%s1880_s25 + $0x158] sm:$0xf]  ;;  %v1504_v48 = vld [vmem:[%s1880_s25 + $0x160] sm:$0xf0]  ;;  %v1291_v49 = vld [vmem:[%s1880_s25 + $0xfc] sm:$0xf0] }
  0x64   : > { %1546 = vmatpush.bf16.msrb.mxu3 %v1518_v16 }
  0x68   : > { %1547 = vmatpush.bf16.msrb.mxu3 %v1517_v19 }
  0x6c   : > { %1548 = vmatpush.bf16.msrb.mxu3 %v1516_v22  ;;  %v1475_v22 = vld [vmem:[%s1880_s25 + $0x7c] sm:$0xf] }
  0x6f   : > { %745 = vmatmul.bf16.gmra.mxu0 %v1194_v56  ;;  %805 = vmatmul.bf16.gmra.mxu3 %v1338_v57  ;;  %v1997_v56 = vld [vmem:[%s2182_s2] ss:$0 sm:$0xff] }
  0x70   : > { %1549 = vmatpush.bf16.msra.mxu3 %v1892_v2  ;;  %834 = vmatmul.bf16.gmra.mxu1 %v1198_v58  ;;  %v1213_v2 = vld [vmem:[%s1880_s25 + $0x50] sm:$0xf]  ;;  %v1265_v57 = vld [vmem:[%s1880_s25 + $0xc0] sm:$0xf]  ;;  %v1485_v58 = vld [vmem:[%s1880_s25 + $0xc8] sm:$0xf0] }
  0x71   : > { %923 = vmatmul.bf16.gmra.mxu2 %v1202_v59  ;;  %v1214_v7 = vor.u32 %v1471_v3, %v1213_v2  ;;  %v1484_v59 = vld [vmem:[%s1880_s25 + $0xc4] sm:$0xf]  ;;  %v1266_v1 = vor.u32 %v1485_v58, %v1265_v57  ;;  %v1322_v2 = vor.u32 %v1498_v61, %v1321_v60  ;;  %v1346_v57 = vor.u32 %v1504_v48, %v1345_v47 }
  0x72   : > { %v1294_v60 = vor.u32 %v1490_v46, %v1291_v49  ;;  %v1298_v61 = vor.u32 %v1492_v51, %v1297_v50 }
  0x74   : > { %1550 = vmatpush.bf16.msra.mxu3 %v1898_v5  ;;  %v1350_v5 = vor.u32 %v1506_v63, %v1349_v62  ;;  %v1267_v62 = vld [vmem:[%s1880_s25 + $0xcc] sm:$0xf0]  ;;  %v1273_v63 = vld [vmem:[%s1880_s25 + $0xc8] sm:$0xf] }
  0x78   : > { %1551 = vmatpush.bf16.msra.mxu3 %v1902_v8  ;;  %v1217_v8 = vld [vmem:[%s1880_s25 + $0x60] sm:$0xf] }
  0x79   : > { %v1218_v16 = vor.u32 %v1473_v9, %v1217_v8 }
  0x7c   : > { %1552 = vmatpush.bf16.msra.mxu3 %v1905_v11  ;;  %v1496_v11 = vld [vmem:[%s1880_s25 + $0x124] sm:$0xf] }
  0x7f   : > { %750 = vmatmul.bf16.gmra.mxu0 %v1206_v4  ;;  %810 = vmatmul.bf16.gmra.mxu3 %v1350_v5  ;;  %v1270_v4 = vor.u32 %v1484_v59, %v1267_v62  ;;  %v1274_v5 = vor.u32 %v1486_v0, %v1273_v63 }
  0x80   : > { %1553 = vmatpush.bf16.msra.mxu3 %v1908_v14  ;;  %839 = vmatmul.bf16.gmra.mxu1 %v1210_v6  ;;  %v1225_v14 = vld [vmem:[%s1880_s25 + $0x68] sm:$0xf] }
  0x81   : > { %928 = vmatmul.bf16.gmra.mxu2 %v1214_v7  ;;  %v1226_v19 = vor.u32 %v1474_v15, %v1225_v14 }
  0x84   : > { %1554 = vmatpush.bf16.msra.mxu3 %v1911_v17  ;;  %v1318_v17 = vor.u32 %v1496_v11, %v1315_v12 }
  0x88   : > { %1555 = vmatpush.bf16.msra.mxu3 %v1914_v20  ;;  %v1229_v20 = vld [vmem:[%s1880_s25 + $0x78] sm:$0xf] }
  0x89   : > { %v1230_v28 = vor.u32 %v1476_v21, %v1229_v20  ;;  %v1501_v20 = vld [vmem:[%s1880_s25 + $0x148] sm:$0xf0]  ;;  %v1279_v21 = vld [vmem:[%s1880_s25 + $0xe4] sm:$0xf0] }
  0x8c   : > { %1556 = vmatpush.bf16.msra.mxu3 %v1916_v23  ;;  %v1231_v23 = vld [vmem:[%s1880_s25 + $0x84] sm:$0xf0] }
  0x8d   : > { %v1234_v30 = vor.u32 %v1475_v22, %v1231_v23  ;;  %v1285_v22 = vld [vmem:[%s1880_s25 + $0xe0] sm:$0xf] }
  0x8e   : > { %v1286_v32 = vor.u32 %v1489_v24, %v1285_v22 }
  0x8f   : > { %755 = vmatmul.bf16.gmra.mxu0 %v1218_v16  ;;  %884 = vmatmul.bf16.vlgmr.msrb.gmra.mxu3 %v1318_v17  ;;  %v1277_v16 = vld [vmem:[%s1880_s25 + $0xd8] sm:$0xf]  ;;  %v1488_v17 = vld [vmem:[%s1880_s25 + $0xe0] sm:$0xf0] }
  0x90   : > { %844 = vmatmul.bf16.gmra.mxu1 %v1222_v18  ;;  %v1487_v18 = vld [vmem:[%s1880_s25 + $0xdc] sm:$0xf]  ;;  %v1278_v27 = vor.u32 %v1488_v17, %v1277_v16  ;;  %v1309_v16 = vld [vmem:[%s1880_s25 + $0x110] sm:$0xf] }
  0x91   : > { %933 = vmatmul.bf16.gmra.mxu2 %v1226_v19  ;;  %v1333_v19 = vld [vmem:[%s1880_s25 + $0x140] sm:$0xf]  ;;  %v1495_v17 = vld [vmem:[%s1880_s25 + $0x118] sm:$0xf0] }
  0x9f   : > { %760 = vmatmul.bf16.gmra.mxu0 %v1230_v28  ;;  %889 = vmatmul.bf16.gmra.mxu3 %v1330_v29  ;;  %v1334_v28 = vor.u32 %v1501_v20, %v1333_v19 }
  0xa0   : > { %849 = vmatmul.bf16.gmra.mxu1 %v1234_v30 }
  0xa1   : > { %938 = vmatmul.bf16.gmra.mxu2 %v1238_v31  ;;  %v1282_v31 = vor.u32 %v1487_v18, %v1279_v21 }
  0xaf   : > { %765 = vmatmul.bf16.gmra.mxu0 %v1242_v40  ;;  %894 = vmatmul.bf16.gmra.mxu3 %v1342_v41 }
  0xb0   : > { %854 = vmatmul.bf16.gmra.mxu1 %v1246_v42 }
  0xb1   : > { %943 = vmatmul.bf16.gmra.mxu2 %v1250_v43 }
  0xbf   : > { %770 = vmatmul.bf16.gmra.mxu0 %v1254_v52  ;;  %899 = vmatmul.bf16.gmra.mxu3 %v1354_v53 }
  0xc0   : > { %859 = vmatmul.bf16.gmra.mxu1 %v1258_v54 }
  0xc1   : > { %948 = vmatmul.bf16.gmra.mxu2 %v1262_v55  ;;  %v1290_v55 = vor.u32 %v1491_v45, %v1289_v44 }
  0xcc   : > { %v736_v3 = vpop.f32.mrf.mxu0 }
  0xcd   : > { %v737_v6 = vadd.f32 %v1997_v56, %v736_v3  ;;  %v825_v7 = vpop.f32.mrf.mxu1 }
  0xcf   : > { %775 = vmatmul.bf16.gmra.mxu0 %v1266_v1  ;;  %973 = vmatmul.bf16.vlgmr.msra.gmra.mxu3 %v1322_v2  ;;  %v826_v8 = vadd.f32 %v825_v7, %v737_v6 }
  0xd0   : > { %864 = vmatmul.bf16.gmra.mxu1 %v1270_v4 }
  0xd1   : > { %953 = vmatmul.bf16.gmra.mxu2 %v1274_v5 }
  0xd2   : > { %v2008_v9 = vpop.f32.mrf.mxu3 }
  0xd4   : > { %v914_v10 = vpop.f32.mrf.mxu2  ;;  %v738_v12 = vpop.f32.mrf.mxu0 }
  0xd5   : > { %v915_v11 = vadd.f32 %v914_v10, %v826_v8  ;;  %v827_v13 = vpop.f32.mrf.mxu1  ;;  %v739_v15 = vadd.f32 %v1997_v56, %v738_v12  ;;  %v1301_v10 = vld [vmem:[%s1880_s25 + $0x108] sm:$0xf]  ;;  %v1493_v12 = vld [vmem:[%s1880_s25 + $0x10c] sm:$0xf] }
  0xd7   : > { %v994_v14 = vmax.f32 %v915_v11, 0.0  ;;  %v828_v25 = vadd.f32 %v827_v13, %v739_v15  ;;  %v1494_v11 = vld [vmem:[%s1880_s25 + $0x110] sm:$0xf0]  ;;  %v1357_v13 = vld [vmem:[%s1880_s25 + $0x170] sm:$0xf] }
  0xd8   : > { %v1303_v15 = vld [vmem:[%s1880_s25 + $0x114] sm:$0xf0]  ;;  %v1302_v21 = vor.u32 %v1494_v11, %v1301_v10 }
  0xd9   : > { %1026 = vst [vmem:[%s2014_s20] sm:$0xff] %v994_v14  ;;  %v1507_v14 = vld [vmem:[%s1880_s25 + $0x178] sm:$0xf0] }
  0xda   : > { %v2023_v23 = vpop.f32.mrf.mxu3  ;;  %v1358_v22 = vor.u32 %v1507_v14, %v1357_v13 }
  0xdc   : > { %v916_v26 = vpop.f32.mrf.mxu2  ;;  %v741_v30 = vpop.f32.mrf.mxu0 }
  0xdd   : > { %v917_v29 = vadd.f32 %v916_v26, %v828_v25  ;;  %v742_v33 = vadd.f32 %v1997_v56, %v741_v30  ;;  %v830_v34 = vpop.f32.mrf.mxu1  ;;  %v1306_v26 = vor.u32 %v1493_v12, %v1303_v15 }
  0xdf   : > { %v995_v35 = vmax.f32 %v917_v29, 0.0  ;;  %780 = vmatmul.bf16.gmra.mxu0 %v1278_v27  ;;  %978 = vmatmul.bf16.gmra.mxu3 %v1334_v28  ;;  %v831_v36 = vadd.f32 %v830_v34, %v742_v33  ;;  %v1310_v27 = vor.u32 %v1495_v17, %v1309_v16 }
  0xe0   : > { %869 = vmatmul.bf16.gmra.mxu1 %v1282_v31 }
  0xe1   : > { %1027 = vst [vmem:[%s2014_s20 + $0x8] sm:$0xff] %v995_v35  ;;  %958 = vmatmul.bf16.gmra.mxu2 %v1286_v32 }
  0xe2   : > { %v2027_v37 = vpop.f32.mrf.mxu3 }
  0xe4   : > { %v919_v38 = vpop.f32.mrf.mxu2  ;;  %v743_v40 = vpop.f32.mrf.mxu0 }
  0xe5   : > { %v920_v39 = vadd.f32 %v919_v38, %v831_v36  ;;  %v832_v41 = vpop.f32.mrf.mxu1  ;;  %v744_v43 = vadd.f32 %v1997_v56, %v743_v40 }
  0xe7   : > { %v996_v42 = vmax.f32 %v920_v39, 0.0  ;;  %v833_v52 = vadd.f32 %v832_v41, %v744_v43 }
  0xe9   : > { %1028 = vst [vmem:[%s2014_s20 + $0x10] sm:$0xff] %v996_v42 }
  0xea   : > { %v2039_v53 = vpop.f32.mrf.mxu3 }
  0xec   : > { %v921_v54 = vpop.f32.mrf.mxu2  ;;  %v746_v59 = vpop.f32.mrf.mxu0 }
  0xed   : > { %v922_v58 = vadd.f32 %v921_v54, %v833_v52  ;;  %v747_v62 = vadd.f32 %v1997_v56, %v746_v59  ;;  %v835_v63 = vpop.f32.mrf.mxu1 }
  0xef   : > { %v997_v0 = vmax.f32 %v922_v58, 0.0  ;;  %785 = vmatmul.bf16.gmra.mxu0 %v1290_v55  ;;  %983 = vmatmul.bf16.gmra.mxu3 %v1346_v57  ;;  %v836_v1 = vadd.f32 %v835_v63, %v747_v62 }
  0xf0   : > { %874 = vmatmul.bf16.gmra.mxu1 %v1294_v60 }
  0xf1   : > { %1029 = vst [vmem:[%s2014_s20 + $0x18] sm:$0xff] %v997_v0  ;;  %963 = vmatmul.bf16.gmra.mxu2 %v1298_v61 }
  0xf2   : > { %v2043_v2 = vpop.f32.mrf.mxu3 }
  0xf4   : > { %v924_v3 = vpop.f32.mrf.mxu2  ;;  %v748_v5 = vpop.f32.mrf.mxu0 }
  0xf5   : > { %v925_v4 = vadd.f32 %v924_v3, %v836_v1  ;;  %v837_v6 = vpop.f32.mrf.mxu1  ;;  %v749_v8 = vadd.f32 %v1997_v56, %v748_v5 }
  0xf7   : > { %v998_v7 = vmax.f32 %v925_v4, 0.0  ;;  %v838_v18 = vadd.f32 %v837_v6, %v749_v8 }
  0xf9   : > { %1030 = vst [vmem:[%s2014_s20 + $0x20] sm:$0xff] %v998_v7 }
  0xfa   : > { %v2055_v19 = vpop.f32.mrf.mxu3 }
  0xfc   : > { %v926_v20 = vpop.f32.mrf.mxu2  ;;  %v751_v25 = vpop.f32.mrf.mxu0 }
  0xfd   : > { %v927_v24 = vadd.f32 %v926_v20, %v838_v18  ;;  %v752_v28 = vadd.f32 %v1997_v56, %v751_v25  ;;  %v840_v29 = vpop.f32.mrf.mxu1 }
  0xff   : > { %v999_v30 = vmax.f32 %v927_v24, 0.0  ;;  %790 = vmatmul.bf16.gmra.mxu0 %v1302_v21  ;;  %988 = vmatmul.bf16.gmra.mxu3 %v1358_v22  ;;  %v841_v31 = vadd.f32 %v840_v29, %v752_v28 }
 0x100   : > { %879 = vmatmul.bf16.gmra.mxu1 %v1306_v26 }
 0x101   : > { %1031 = vst [vmem:[%s2014_s20 + $0x28] sm:$0xff] %v999_v30  ;;  %968 = vmatmul.bf16.gmra.mxu2 %v1310_v27 }
 0x102   : > { %v2059_v32 = vpop.f32.mrf.mxu3 }
 0x104   : > { %v929_v33 = vpop.f32.mrf.mxu2  ;;  %v753_v35 = vpop.f32.mrf.mxu0 }
 0x105   : > { %v930_v34 = vadd.f32 %v929_v33, %v841_v31  ;;  %v842_v36 = vpop.f32.mrf.mxu1  ;;  %v754_v39 = vadd.f32 %v1997_v56, %v753_v35 }
 0x107   : > { %v1000_v38 = vmax.f32 %v930_v34, 0.0  ;;  %v843_v40 = vadd.f32 %v842_v36, %v754_v39 }
 0x109   : > { %1032 = vst [vmem:[%s2014_s20 + $0x30] sm:$0xff] %v1000_v38 }
 0x10a   : > { %v2063_v41 = vpop.f32.mrf.mxu3 }
 0x10c   : > { %v931_v42 = vpop.f32.mrf.mxu2  ;;  %v756_v44 = vpop.f32.mrf.mxu0 }
 0x10d   : > { %v932_v43 = vadd.f32 %v931_v42, %v843_v40  ;;  %v757_v45 = vadd.f32 %v1997_v56, %v756_v44  ;;  %v845_v46 = vpop.f32.mrf.mxu1 }
 0x10f   : > { %v1001_v47 = vmax.f32 %v932_v43, 0.0  ;;  %v846_v48 = vadd.f32 %v845_v46, %v757_v45 }
 0x111   : > { %1033 = vst [vmem:[%s2014_s20 + $0x38] sm:$0xff] %v1001_v47 }
 0x112   : > { %v2067_v49 = vpop.f32.mrf.mxu3 }
 0x114   : > { %v934_v50 = vpop.f32.mrf.mxu2  ;;  %v758_v52 = vpop.f32.mrf.mxu0 }
 0x115   : > { %v935_v51 = vadd.f32 %v934_v50, %v846_v48  ;;  %v847_v54 = vpop.f32.mrf.mxu1  ;;  %v759_v57 = vadd.f32 %v1997_v56, %v758_v52 }
 0x117   : > { %v1002_v55 = vmax.f32 %v935_v51, 0.0  ;;  %v848_v58 = vadd.f32 %v847_v54, %v759_v57 }
 0x119   : > { %1034 = vst [vmem:[%s2014_s20 + $0x40] sm:$0xff] %v1002_v55 }
 0x11a   : > { %v2071_v59 = vpop.f32.mrf.mxu3 }
 0x11c   : > { %v936_v60 = vpop.f32.mrf.mxu2  ;;  %v761_v62 = vpop.f32.mrf.mxu0 }
 0x11d   : > { %v937_v61 = vadd.f32 %v936_v60, %v848_v58  ;;  %v762_v63 = vadd.f32 %v1997_v56, %v761_v62  ;;  %v850_v0 = vpop.f32.mrf.mxu1 }
 0x11f   : > { %v1003_v1 = vmax.f32 %v937_v61, 0.0  ;;  %v851_v3 = vadd.f32 %v850_v0, %v762_v63  ;;  %v797_v61 = vadd.f32 %v1997_v56, %v2008_v9 }
 0x121   : > { %1035 = vst [vmem:[%s2014_s20 + $0x48] sm:$0xff] %v1003_v1  ;;  %v886_v63 = vadd.f32 %v2067_v49, %v797_v61 }
 0x122   : > { %v2075_v4 = vpop.f32.mrf.mxu3 }
 0x124   : > { %v939_v5 = vpop.f32.mrf.mxu2  ;;  %v763_v7 = vpop.f32.mrf.mxu0 }
 0x125   : > { %v940_v6 = vadd.f32 %v939_v5, %v851_v3  ;;  %v852_v8 = vpop.f32.mrf.mxu1  ;;  %v764_v11 = vadd.f32 %v1997_v56, %v763_v7 }
 0x127   : > { %v1004_v10 = vmax.f32 %v940_v6, 0.0  ;;  %v853_v12 = vadd.f32 %v852_v8, %v764_v11 }
 0x129   : > { %1036 = vst [vmem:[%s2014_s20 + $0x50] sm:$0xff] %v1004_v10 }
 0x12a   : > { %v2079_v13 = vpop.f32.mrf.mxu3 }
 0x12c   : > { %v941_v14 = vpop.f32.mrf.mxu2  ;;  %v766_v16 = vpop.f32.mrf.mxu0 }
 0x12d   : > { %v942_v15 = vadd.f32 %v941_v14, %v853_v12  ;;  %v767_v17 = vadd.f32 %v1997_v56, %v766_v16  ;;  %v855_v18 = vpop.f32.mrf.mxu1  ;;  %v799_v12 = vadd.f32 %v1997_v56, %v2023_v23  ;;  %v802_v23 = vadd.f32 %v1997_v56, %v2027_v37 }
 0x12e   : > { %v804_v37 = vadd.f32 %v1997_v56, %v2039_v53  ;;  %v807_v53 = vadd.f32 %v1997_v56, %v2043_v2  ;;  %v809_v2 = vadd.f32 %v1997_v56, %v2055_v19 }
 0x12f   : > { %v1005_v20 = vmax.f32 %v942_v15, 0.0  ;;  %v856_v21 = vadd.f32 %v855_v18, %v767_v17  ;;  %v888_v9 = vadd.f32 %v2071_v59, %v799_v12  ;;  %v891_v59 = vadd.f32 %v2075_v4, %v802_v23 }
 0x131   : > { %1037 = vst [vmem:[%s2014_s20 + $0x58] sm:$0xff] %v1005_v20 }
 0x132   : > { %v2083_v22 = vpop.f32.mrf.mxu3 }
 0x134   : > { %v944_v24 = vpop.f32.mrf.mxu2  ;;  %v768_v26 = vpop.f32.mrf.mxu0 }
 0x135   : > { %v945_v25 = vadd.f32 %v944_v24, %v856_v21  ;;  %v857_v27 = vpop.f32.mrf.mxu1  ;;  %v769_v29 = vadd.f32 %v1997_v56, %v768_v26 }
 0x137   : > { %v1006_v28 = vmax.f32 %v945_v25, 0.0  ;;  %v858_v30 = vadd.f32 %v857_v27, %v769_v29 }
 0x139   : > { %1038 = vst [vmem:[%s2014_s20 + $0x60] sm:$0xff] %v1006_v28 }
 0x13a   : > { %v2087_v31 = vpop.f32.mrf.mxu3 }
 0x13c   : > { %v946_v33 = vpop.f32.mrf.mxu2  ;;  %v771_v35 = vpop.f32.mrf.mxu0 }
 0x13d   : > { %v947_v34 = vadd.f32 %v946_v33, %v858_v30  ;;  %v772_v36 = vadd.f32 %v1997_v56, %v771_v35  ;;  %v860_v38 = vpop.f32.mrf.mxu1 }
 0x13f   : > { %v1007_v39 = vmax.f32 %v947_v34, 0.0  ;;  %v861_v40 = vadd.f32 %v860_v38, %v772_v36 }
 0x141   : > { %1039 = vst [vmem:[%s2014_s20 + $0x68] sm:$0xff] %v1007_v39  ;;  %v893_v39 = vadd.f32 %v2079_v13, %v804_v37  ;;  %v896_v13 = vadd.f32 %v2083_v22, %v807_v53 }
 0x142   : > { %v2091_v42 = vpop.f32.mrf.mxu3 }
 0x144   : > { %v949_v43 = vpop.f32.mrf.mxu2  ;;  %v773_v45 = vpop.f32.mrf.mxu0 }
 0x145   : > { %v950_v44 = vadd.f32 %v949_v43, %v861_v40  ;;  %v862_v46 = vpop.f32.mrf.mxu1  ;;  %v774_v48 = vadd.f32 %v1997_v56, %v773_v45 }
 0x147   : > { %v1008_v47 = vmax.f32 %v950_v44, 0.0  ;;  %v863_v50 = vadd.f32 %v862_v46, %v774_v48 }
 0x149   : > { %1040 = vst [vmem:[%s2014_s20 + $0x70] sm:$0xff] %v1008_v47 }
 0x14a   : > { %v2095_v51 = vpop.f32.mrf.mxu3 }
 0x14c   : > { %v951_v52 = vpop.f32.mrf.mxu2  ;;  %v776_v55 = vpop.f32.mrf.mxu0 }
 0x14d   : > { %v952_v54 = vadd.f32 %v951_v52, %v863_v50  ;;  %v777_v57 = vadd.f32 %v1997_v56, %v776_v55  ;;  %v865_v58 = vpop.f32.mrf.mxu1 }
 0x14f   : > { %v1009_v60 = vmax.f32 %v952_v54, 0.0  ;;  %v866_v62 = vadd.f32 %v865_v58, %v777_v57 }
 0x151   : > { %1041 = vst [vmem:[%s2014_s20 + $0x78] sm:$0xff] %v1009_v60 }
 0x152   : > { %v974_v0 = vpop.f32.mrf.mxu3 }
 0x153   : > { %v975_v3 = vadd.f32 %v974_v0, %v886_v63 }
 0x154   : > { %v954_v1 = vpop.f32.mrf.mxu2  ;;  %v778_v6 = vpop.f32.mrf.mxu0 }
 0x155   : > { %v955_v5 = vadd.f32 %v954_v1, %v866_v62  ;;  %v1018_v7 = vmax.f32 %v975_v3, 0.0  ;;  %v867_v8 = vpop.f32.mrf.mxu1  ;;  %v779_v11 = vadd.f32 %v1997_v56, %v778_v6  ;;  %v898_v3 = vadd.f32 %v2087_v31, %v809_v2 }
 0x157   : > { %v1010_v10 = vmax.f32 %v955_v5, 0.0  ;;  %1050 = vst [vmem:[%s2014_s20 + $0xc0] sm:$0xff] %v1018_v7  ;;  %v868_v49 = vadd.f32 %v867_v8, %v779_v11 }
 0x159   : > { %1042 = vst [vmem:[%s2014_s20 + $0x80] sm:$0xff] %v1010_v10 }
 0x15a   : > { %v976_v14 = vpop.f32.mrf.mxu3 }
 0x15b   : > { %v977_v16 = vadd.f32 %v976_v14, %v888_v9 }
 0x15c   : > { %v956_v15 = vpop.f32.mrf.mxu2  ;;  %v781_v18 = vpop.f32.mrf.mxu0 }
 0x15d   : > { %v957_v17 = vadd.f32 %v956_v15, %v868_v49  ;;  %v1019_v20 = vmax.f32 %v977_v16, 0.0  ;;  %v782_v21 = vadd.f32 %v1997_v56, %v781_v18  ;;  %v870_v24 = vpop.f32.mrf.mxu1  ;;  %v812_v49 = vadd.f32 %v1997_v56, %v2059_v32 }
 0x15e   : > { %v814_v32 = vadd.f32 %v1997_v56, %v2063_v41 }
 0x15f   : > { %v1011_v25 = vmax.f32 %v957_v17, 0.0  ;;  %1051 = vst [vmem:[%s2014_s20 + $0xc8] sm:$0xff] %v1019_v20  ;;  %v871_v26 = vadd.f32 %v870_v24, %v782_v21  ;;  %v901_v14 = vadd.f32 %v2091_v42, %v812_v49 }
 0x160   : > { %v903_v42 = vadd.f32 %v2095_v51, %v814_v32 }
 0x161   : > { %1043 = vst [vmem:[%s2014_s20 + $0x88] sm:$0xff] %v1011_v25 }
 0x162   : > { %v979_v27 = vpop.f32.mrf.mxu3 }
 0x163   : > { %v980_v29 = vadd.f32 %v979_v27, %v891_v59 }
 0x164   : > { %v959_v28 = vpop.f32.mrf.mxu2  ;;  %v783_v33 = vpop.f32.mrf.mxu0 }
 0x165   : > { %v960_v30 = vadd.f32 %v959_v28, %v871_v26  ;;  %v1020_v34 = vmax.f32 %v980_v29, 0.0  ;;  %v872_v35 = vpop.f32.mrf.mxu1  ;;  %v784_v38 = vadd.f32 %v1997_v56, %v783_v33 }
 0x167   : > { %v1012_v36 = vmax.f32 %v960_v30, 0.0  ;;  %1052 = vst [vmem:[%s2014_s20 + $0xd0] sm:$0xff] %v1020_v34  ;;  %v873_v4 = vadd.f32 %v872_v35, %v784_v38 }
 0x169   : > { %1044 = vst [vmem:[%s2014_s20 + $0x90] sm:$0xff] %v1012_v36 }
 0x16a   : > { %v981_v40 = vpop.f32.mrf.mxu3 }
 0x16b   : > { %v982_v44 = vadd.f32 %v981_v40, %v893_v39 }
 0x16c   : > { %v961_v43 = vpop.f32.mrf.mxu2  ;;  %v786_v46 = vpop.f32.mrf.mxu0 }
 0x16d   : > { %v962_v45 = vadd.f32 %v961_v43, %v873_v4  ;;  %v1021_v47 = vmax.f32 %v982_v44, 0.0  ;;  %v787_v48 = vadd.f32 %v1997_v56, %v786_v46  ;;  %v875_v50 = vpop.f32.mrf.mxu1 }
 0x16f   : > { %v1013_v52 = vmax.f32 %v962_v45, 0.0  ;;  %1053 = vst [vmem:[%s2014_s20 + $0xd8] sm:$0xff] %v1021_v47  ;;  %v876_v54 = vadd.f32 %v875_v50, %v787_v48 }
 0x171   : > { %1045 = vst [vmem:[%s2014_s20 + $0x98] sm:$0xff] %v1013_v52 }
 0x172   : > { %v984_v55 = vpop.f32.mrf.mxu3 }
 0x173   : > { %v985_v58 = vadd.f32 %v984_v55, %v896_v13 }
 0x174   : > { %v964_v57 = vpop.f32.mrf.mxu2  ;;  %v788_v61 = vpop.f32.mrf.mxu0 }
 0x175   : > { %v965_v60 = vadd.f32 %v964_v57, %v876_v54  ;;  %v1022_v62 = vmax.f32 %v985_v58, 0.0  ;;  %v877_v63 = vpop.f32.mrf.mxu1  ;;  %v789_v1 = vadd.f32 %v1997_v56, %v788_v61 }
 0x177   : > { %v1014_v0 = vmax.f32 %v965_v60, 0.0  ;;  %1054 = vst [vmem:[%s2014_s20 + $0xe0] sm:$0xff] %v1022_v62  ;;  %v878_v22 = vadd.f32 %v877_v63, %v789_v1 }
 0x179   : > { %1046 = vst [vmem:[%s2014_s20 + $0xa0] sm:$0xff] %v1014_v0 }
 0x17a   : > { %v986_v5 = vpop.f32.mrf.mxu3 }
 0x17b   : > { %v987_v7 = vadd.f32 %v986_v5, %v898_v3 }
 0x17c   : > { %v966_v6 = vpop.f32.mrf.mxu2  ;;  %v791_v10 = vpop.f32.mrf.mxu0 }
 0x17d   : > { %v967_v8 = vadd.f32 %v966_v6, %v878_v22  ;;  %v1023_v11 = vmax.f32 %v987_v7, 0.0  ;;  %v792_v12 = vadd.f32 %v1997_v56, %v791_v10  ;;  %v880_v19 = vpop.f32.mrf.mxu1 }
 0x17f   : > { %v1015_v9 = vmax.f32 %v967_v8, 0.0  ;;  %1055 = vst [vmem:[%s2014_s20 + $0xe8] sm:$0xff] %v1023_v11  ;;  %v881_v31 = vadd.f32 %v880_v19, %v792_v12 }
 0x181   : > { %1047 = vst [vmem:[%s2014_s20 + $0xa8] sm:$0xff] %v1015_v9 }
 0x182   : > { %v989_v15 = vpop.f32.mrf.mxu3 }
 0x183   : > { %v990_v17 = vadd.f32 %v989_v15, %v901_v14 }
 0x184   : > { %v969_v16 = vpop.f32.mrf.mxu2  ;;  %v793_v20 = vpop.f32.mrf.mxu0 }
 0x185   : > { %v970_v18 = vadd.f32 %v969_v16, %v881_v31  ;;  %v1024_v21 = vmax.f32 %v990_v17, 0.0  ;;  %v794_v25 = vadd.f32 %v1997_v56, %v793_v20  ;;  %v882_v23 = vpop.f32.mrf.mxu1 }
 0x187   : > { %v1016_v24 = vmax.f32 %v970_v18, 0.0  ;;  %1056 = vst [vmem:[%s2014_s20 + $0xf0] sm:$0xff] %v1024_v21  ;;  %v883_v26 = vadd.f32 %v882_v23, %v794_v25 }
 0x189   : > { %1048 = vst [vmem:[%s2014_s20 + $0xb0] sm:$0xff] %v1016_v24 }
 0x18a   : > { %v991_v59 = vpop.f32.mrf.mxu3 }
 0x18b   : > { %v992_v28 = vadd.f32 %v991_v59, %v903_v42 }
 0x18c   : > { %v971_v27 = vpop.f32.mrf.mxu2 }
 0x18d   : > { %v972_v56 = vadd.f32 %v971_v27, %v883_v26  ;;  %v1025_v41 = vmax.f32 %v992_v28, 0.0 }
 0x18f   : > { %v1017_v29 = vmax.f32 %v972_v56, 0.0  ;;  %1057 = vst [vmem:[%s2014_s20 + $0xf8] sm:$0xff] %v1025_v41 }
 0x191   : > { %1049 = vst [vmem:[%s2014_s20 + $0xb8] sm:$0xff] %v1017_v29 }
 0x192   : > { %1711 = shalt.err (!%p1708_p10)
}
 0x193   : > { %s1761_s10 = smov 128   ;;  %s1762_s18 = smov 8  }
 0x194   : > { %1566 = dma.vmem_to_hbm [thread:$0]  (%p1850_p7), %s1072_s16, 4096, %s1074_s29, %s1059_s30, %s1761_s10, %s1761_s10, %s1762_s18  }
 0x195 PF: > { %s1088_s23 = sand.u32 1, %s1742_s12   ;;  %p2189_p12 = scmp.ge.s32.totalorder %s1754_s15, 2 }
 0x196   : > { %s1089_s17 = scalar_lea.sflag [#allocation4], %s1088_s23 }
 0x197   : > { %p1577_p13 = pnand %p2189_p12, %p1818_p6 }
 0x199   : > { %p1578_p0 = pneg %p1577_p13 }
 0x19b   : > { %1737 = dma.done.wait (%p1578_p0), %s1089_s17, 4096  }
 0x19c   : > { %1739 = vsyncadd (%p1578_p0), %s1089_s17, 4294963200  ;;  %p17_p3 = scmp.ge.s32.totalorder %s1836_s26, 4   ;;  %s2190_s12 = smov %s1746_s13 }
 0x19d   : > { %s2191_s13 = smov %s1750_s14  ;;  %s2192_s14 = smov %s1846_s4 }
 0x19e   : > { %s2193_s15 = smov %s1836_s26  ;;  %19 = sbr.rel (!%p17_p3) target bundleno = 6 (0x6), region = 81 }
 0x1a3   :  { %1095 = vsyncpa [#allocation3], 1 }
 0x1a4   :  { %1097 = vsyncpa [#allocation3 + $0x1], 1 }
 0x1a5   :  { %1098 = vsyncpa [#allocation6], 1 }
 0x1a6   :  { %1099 = vsyncpa [#allocation4], 1 }
 0x1a7   :  { %1101 = vsyncpa [#allocation4 + $0x1], 1 }

</bundles_post_ra>
